<compile_context>
chip_gen: v6e
topology: v6e:2x2x1
jax: 0.10.0
libtpu: 0.0.40
codegen_flags: <defaults>
</compile_context>

<pallas_src>
import math
from functools import partial

import jax
import jax.numpy as jnp
from jax import lax
from jax.experimental import pallas as pl
from jax.experimental.pallas import tpu as pltpu


def _linformer_kernel(q_ref, k_ref, v_ref, pkT_ref, pvT_ref, o_ref, *,
                      heads, d_h, scale):
    # q_ref:         (1, n, h*d_h) — head hi lives in lanes [hi*d_h, (hi+1)*d_h)
    # k_ref/v_ref:   (1, n, d) native channel-last layout
    # pkT_ref/pvT_ref: (kproj, n) pre-transposed projection matrices
    q = q_ref[0]           # (n, h*d_h)
    kk = k_ref[0]          # (n, d)
    vv = v_ref[0]          # (n, d)
    pkT = pkT_ref[...]     # (kproj, n)
    pvT = pvT_ref[...]     # (kproj, n)

    # Fused sequence-axis projection for all heads at once:
    # (kproj, n) @ (n, d) -> (kproj, d). Natural (last, first) contraction.
    kp = jnp.dot(pkT, kk, preferred_element_type=jnp.float32)
    vp = jnp.dot(pvT, vv, preferred_element_type=jnp.float32)

    # Fold the attention scale into q (d_h lanes/row — cheaper than scaling
    # the (n, kproj) score tile).
    q_s = q.astype(jnp.float32) * scale

    outs = []
    for hi in range(heads):            # static unroll keeps the MXU pipe full
        lo = hi * d_h
        q_h = q_s[:, lo:lo + d_h]      # (n, d_h)
        kp_h = kp[:, lo:lo + d_h]      # (kproj, d_h)
        vp_h = vp[:, lo:lo + d_h]      # (kproj, d_h)

        # Scores (n, kproj): contract d_h (RHS-transposed matmul).
        dots = lax.dot_general(q_h, kp_h, (((1,), (1,)), ((), ())),
                               preferred_element_type=jnp.float32)

        # Numerically stable softmax over the projected-key axis (fp32).
        dots = dots - jnp.max(dots, axis=-1, keepdims=True)
        e = jnp.exp(dots)
        attn = e * pl.reciprocal(jnp.sum(e, axis=-1, keepdims=True), approx=True)

        # Weighted sum of projected values: (n, d_h)
        outs.append(jnp.dot(attn, vp_h, preferred_element_type=jnp.float32))

    # One lane-dense (n, h*d_h) store instead of h narrow masked stores.
    o_ref[0] = jnp.concatenate(outs, axis=-1).astype(o_ref.dtype)


def linformer_attention(queries, keys, values, proj_k, proj_v):
    """queries: (b, h, n, d_h); keys/values: (b, n, h*d_h); proj_*: (n, kproj).

    Returns (b, n, h*d_h), matching the torch forward (share_kv=False).
    """
    b, h, n, d_h = queries.shape
    d = keys.shape[-1]
    assert d == h * d_h, "kernel assumes model dim == heads * dim_head"
    kproj = proj_k.shape[-1]

    # Free row-major reinterpret reproducing torch's
    # `queries.reshape(b, n, h, -1).transpose(1, 2)` quirk: head hi of the
    # torch-transposed queries is exactly lane slice [hi*d_h:(hi+1)*d_h] here.
    q2d = queries.reshape(b, n, h * d_h)

    # One-time (tiny) parameter transform so in-kernel matmuls need no
    # sublane-dim contraction / XLU transpose of the projection tiles.
    pkT = proj_k.T
    pvT = proj_v.T

    kernel = partial(_linformer_kernel, heads=h, d_h=d_h, scale=d_h ** (-0.5))

    return pl.pallas_call(
        kernel,
        out_shape=jax.ShapeDtypeStruct((b, n, h * d_h), queries.dtype),
        grid_spec=pltpu.PrefetchScalarGridSpec(
            num_scalar_prefetch=0,
            grid=(b,),
            in_specs=[
                pl.BlockSpec((1, n, h * d_h), lambda bi: (bi, 0, 0)),  # q
                pl.BlockSpec((1, n, d), lambda bi: (bi, 0, 0)),        # keys
                pl.BlockSpec((1, n, d), lambda bi: (bi, 0, 0)),        # values
                pl.BlockSpec((kproj, n), lambda bi: (0, 0)),           # proj_k^T
                pl.BlockSpec((kproj, n), lambda bi: (0, 0)),           # proj_v^T
            ],
            out_specs=pl.BlockSpec((1, n, h * d_h), lambda bi: (bi, 0, 0)),
        ),
        compiler_params=pltpu.CompilerParams(
            dimension_semantics=("parallel",)),  # batch splits across TCs (v7x)
    )(q2d, keys, values, pkT, pvT)


def linformer_attention_ref(queries, keys, values, proj_k, proj_v):
    """Pure-JAX transcription of the torch forward (share_kv=False)."""
    b, h, n, d_h = queries.shape
    kproj = proj_k.shape[-1]
    kp = jnp.einsum('bnd,nk->bkd', keys, proj_k)
    vp = jnp.einsum('bnd,nk->bkd', values, proj_v)
    q = queries.reshape(b, n, h, d_h).transpose(0, 2, 1, 3)
    K = jnp.broadcast_to(kp.reshape(b, kproj, -1, d_h).transpose(0, 2, 1, 3),
                         (b, h, kproj, d_h))
    V = jnp.broadcast_to(vp.reshape(b, kproj, -1, d_h).transpose(0, 2, 1, 3),
                         (b, h, kproj, d_h))
    dots = jnp.einsum('bhnd,bhkd->bhnk', q, K) * d_h ** (-0.5)
    attn = jax.nn.softmax(dots, axis=-1)
    out = jnp.einsum('bhnk,bhkd->bhnd', attn, V)
    return out.transpose(0, 2, 1, 3).reshape(b, n, -1)


if __name__ == "__main__":
    # Small shapes consistent with the module structure.
    SEQ = 16      # seq_len (n)
    KPROJ = 20    # Linformer projection length k
    DIM = 32      # model dim
    HEADS = 4
    DH = DIM // HEADS  # dim_head = 8
    B = 2

    root = jax.random.PRNGKey(0)
    kq, kk, kv, kpk, kpv = jax.random.split(root, 5)

    # Parameter init mirroring init_: uniform(-1/sqrt(k), 1/sqrt(k)).
    std = 1.0 / math.sqrt(KPROJ)
    proj_k = jax.random.uniform(kpk, (SEQ, KPROJ), minval=-std, maxval=std,
                                dtype=jnp.float32)
    proj_v = jax.random.uniform(kpv, (SEQ, KPROJ), minval=-std, maxval=std,
                                dtype=jnp.float32)

    queries = jax.random.normal(kq, (B, HEADS, SEQ, DH), dtype=jnp.float32)
    keys = jax.random.normal(kk, (B, SEQ, HEADS * DH), dtype=jnp.float32)
    values = jax.random.normal(kv, (B, SEQ, HEADS * DH), dtype=jnp.float32)

    out = linformer_attention(queries, keys, values, proj_k, proj_v)
    out = jax.block_until_ready(out)

    ref = linformer_attention_ref(queries, keys, values, proj_k, proj_v)
    assert out.shape == (B, SEQ, HEADS * DH), out.shape
    # Tolerance accounts for the EUP approximate reciprocal in the softmax
    # denominator (still catches any head-mapping / scaling bug by a wide margin).
    assert jnp.allclose(out, ref, atol=5e-3, rtol=5e-3), \
        float(jnp.max(jnp.abs(out - ref)))

    print("KERNEL_OK")
</pallas_src>

<mosaic_0001>
module attributes {stable_mosaic.version = 11 : i64} {
  func.func @_linformer_kernel(%arg0: i32, %arg1: memref<1x16x32xf32, #tpu.memory_space<vmem>>, %arg2: memref<1x16x32xf32, #tpu.memory_space<vmem>>, %arg3: memref<1x16x32xf32, #tpu.memory_space<vmem>>, %arg4: memref<20x16xf32, #tpu.memory_space<vmem>>, %arg5: memref<20x16xf32, #tpu.memory_space<vmem>>, %arg6: memref<1x16x32xf32, #tpu.memory_space<vmem>>) attributes {dimension_semantics = [#tpu.dimension_semantics<parallel>], iteration_bounds = array<i64: 2>, scalar_prefetch = 0 : i64, scratch_operands = 0 : i64, tpu.core_type = #tpu.core_type<tc>, window_params = [{transform_indices = @transform_0, window_bounds = array<i64: 1, 16, 32>}, {transform_indices = @transform_1, window_bounds = array<i64: 1, 16, 32>}, {transform_indices = @transform_2, window_bounds = array<i64: 1, 16, 32>}, {pipeline_mode = #tpu.pipeline_mode<synchronous>, transform_indices = @transform_3, window_bounds = array<i64: 20, 16>}, {pipeline_mode = #tpu.pipeline_mode<synchronous>, transform_indices = @transform_4, window_bounds = array<i64: 20, 16>}, {transform_indices = @transform_5, window_bounds = array<i64: 1, 16, 32>}]} {
    %c0 = arith.constant 0 : index
    %c0_0 = arith.constant 0 : index
    %c0_1 = arith.constant 0 : index
    %0 = vector.load %arg1[%c0, %c0_0, %c0_1] : memref<1x16x32xf32, #tpu.memory_space<vmem>>, vector<1x16x32xf32>
    %1 = vector.shape_cast %0 : vector<1x16x32xf32> to vector<16x32xf32>
    %c0_2 = arith.constant 0 : index
    %c0_3 = arith.constant 0 : index
    %c0_4 = arith.constant 0 : index
    %2 = vector.load %arg2[%c0_2, %c0_3, %c0_4] : memref<1x16x32xf32, #tpu.memory_space<vmem>>, vector<1x16x32xf32>
    %3 = vector.shape_cast %2 : vector<1x16x32xf32> to vector<16x32xf32>
    %c0_5 = arith.constant 0 : index
    %c0_6 = arith.constant 0 : index
    %c0_7 = arith.constant 0 : index
    %4 = vector.load %arg3[%c0_5, %c0_6, %c0_7] : memref<1x16x32xf32, #tpu.memory_space<vmem>>, vector<1x16x32xf32>
    %5 = vector.shape_cast %4 : vector<1x16x32xf32> to vector<16x32xf32>
    %c0_8 = arith.constant 0 : index
    %c0_9 = arith.constant 0 : index
    %6 = vector.load %arg4[%c0_8, %c0_9] : memref<20x16xf32, #tpu.memory_space<vmem>>, vector<20x16xf32>
    %c0_10 = arith.constant 0 : index
    %c0_11 = arith.constant 0 : index
    %7 = vector.load %arg5[%c0_10, %c0_11] : memref<20x16xf32, #tpu.memory_space<vmem>>, vector<20x16xf32>
    %cst = arith.constant dense<0.000000e+00> : vector<20x32xf32>
    %8 = tpu.matmul %6, %3, %cst {dimension_numbers = #tpu.dot_dimension_numbers<[1], [0], [0], [1], [0, 0, 1, 1], [], []>} : vector<20x16xf32>, vector<16x32xf32>, vector<20x32xf32> -> vector<20x32xf32>
    %cst_12 = arith.constant dense<0.000000e+00> : vector<20x32xf32>
    %9 = tpu.matmul %7, %5, %cst_12 {dimension_numbers = #tpu.dot_dimension_numbers<[1], [0], [0], [1], [0, 0, 1, 1], [], []>} : vector<20x16xf32>, vector<16x32xf32>, vector<20x32xf32> -> vector<20x32xf32>
    %cst_13 = arith.constant 0.353553385 : f32
    %10 = vector.broadcast %cst_13 : f32 to vector<16x32xf32>
    %11 = arith.mulf %1, %10 : vector<16x32xf32>
    %12 = vector.extract_strided_slice %11 {offsets = [0, 0], sizes = [16, 8], strides = [1, 1]} : vector<16x32xf32> to vector<16x8xf32>
    %13 = vector.extract_strided_slice %8 {offsets = [0, 0], sizes = [20, 8], strides = [1, 1]} : vector<20x32xf32> to vector<20x8xf32>
    %14 = vector.extract_strided_slice %9 {offsets = [0, 0], sizes = [20, 8], strides = [1, 1]} : vector<20x32xf32> to vector<20x8xf32>
    %cst_14 = arith.constant dense<0.000000e+00> : vector<16x20xf32>
    %15 = tpu.matmul %12, %13, %cst_14 {dimension_numbers = #tpu.dot_dimension_numbers<[1], [1], [0], [0], [0, 0, 1, 0], [], []>} : vector<16x8xf32>, vector<20x8xf32>, vector<16x20xf32> -> vector<16x20xf32>
    %cst_15 = arith.constant dense<0xFF800000> : vector<16xf32>
    %16 = vector.multi_reduction <maximumf>, %15, %cst_15 [1] : vector<16x20xf32> to vector<16xf32>
    %17 = vector.shape_cast %16 : vector<16xf32> to vector<16x1xf32>
    %18 = vector.broadcast %17 : vector<16x1xf32> to vector<16x20xf32>
    %19 = arith.subf %15, %18 : vector<16x20xf32>
    %20 = math.exp %19 : vector<16x20xf32>
    %cst_16 = arith.constant dense<0.000000e+00> : vector<16xf32>
    %21 = vector.multi_reduction <add>, %20, %cst_16 [1] : vector<16x20xf32> to vector<16xf32>
    %22 = vector.shape_cast %21 : vector<16xf32> to vector<16x1xf32>
    %23 = tpu.reciprocal %22 {approx = true} : vector<16x1xf32> -> vector<16x1xf32>
    %24 = vector.broadcast %23 : vector<16x1xf32> to vector<16x20xf32>
    %25 = arith.mulf %20, %24 : vector<16x20xf32>
    %cst_17 = arith.constant dense<0.000000e+00> : vector<16x8xf32>
    %26 = tpu.matmul %25, %14, %cst_17 {dimension_numbers = #tpu.dot_dimension_numbers<[1], [0], [0], [1], [0, 0, 1, 1], [], []>} : vector<16x20xf32>, vector<20x8xf32>, vector<16x8xf32> -> vector<16x8xf32>
    %27 = vector.extract_strided_slice %11 {offsets = [0, 8], sizes = [16, 8], strides = [1, 1]} : vector<16x32xf32> to vector<16x8xf32>
    %28 = vector.extract_strided_slice %8 {offsets = [0, 8], sizes = [20, 8], strides = [1, 1]} : vector<20x32xf32> to vector<20x8xf32>
    %29 = vector.extract_strided_slice %9 {offsets = [0, 8], sizes = [20, 8], strides = [1, 1]} : vector<20x32xf32> to vector<20x8xf32>
    %cst_18 = arith.constant dense<0.000000e+00> : vector<16x20xf32>
    %30 = tpu.matmul %27, %28, %cst_18 {dimension_numbers = #tpu.dot_dimension_numbers<[1], [1], [0], [0], [0, 0, 1, 0], [], []>} : vector<16x8xf32>, vector<20x8xf32>, vector<16x20xf32> -> vector<16x20xf32>
    %cst_19 = arith.constant dense<0xFF800000> : vector<16xf32>
    %31 = vector.multi_reduction <maximumf>, %30, %cst_19 [1] : vector<16x20xf32> to vector<16xf32>
    %32 = vector.shape_cast %31 : vector<16xf32> to vector<16x1xf32>
    %33 = vector.broadcast %32 : vector<16x1xf32> to vector<16x20xf32>
    %34 = arith.subf %30, %33 : vector<16x20xf32>
    %35 = math.exp %34 : vector<16x20xf32>
    %cst_20 = arith.constant dense<0.000000e+00> : vector<16xf32>
    %36 = vector.multi_reduction <add>, %35, %cst_20 [1] : vector<16x20xf32> to vector<16xf32>
    %37 = vector.shape_cast %36 : vector<16xf32> to vector<16x1xf32>
    %38 = tpu.reciprocal %37 {approx = true} : vector<16x1xf32> -> vector<16x1xf32>
    %39 = vector.broadcast %38 : vector<16x1xf32> to vector<16x20xf32>
    %40 = arith.mulf %35, %39 : vector<16x20xf32>
    %cst_21 = arith.constant dense<0.000000e+00> : vector<16x8xf32>
    %41 = tpu.matmul %40, %29, %cst_21 {dimension_numbers = #tpu.dot_dimension_numbers<[1], [0], [0], [1], [0, 0, 1, 1], [], []>} : vector<16x20xf32>, vector<20x8xf32>, vector<16x8xf32> -> vector<16x8xf32>
    %42 = vector.extract_strided_slice %11 {offsets = [0, 16], sizes = [16, 8], strides = [1, 1]} : vector<16x32xf32> to vector<16x8xf32>
    %43 = vector.extract_strided_slice %8 {offsets = [0, 16], sizes = [20, 8], strides = [1, 1]} : vector<20x32xf32> to vector<20x8xf32>
    %44 = vector.extract_strided_slice %9 {offsets = [0, 16], sizes = [20, 8], strides = [1, 1]} : vector<20x32xf32> to vector<20x8xf32>
    %cst_22 = arith.constant dense<0.000000e+00> : vector<16x20xf32>
    %45 = tpu.matmul %42, %43, %cst_22 {dimension_numbers = #tpu.dot_dimension_numbers<[1], [1], [0], [0], [0, 0, 1, 0], [], []>} : vector<16x8xf32>, vector<20x8xf32>, vector<16x20xf32> -> vector<16x20xf32>
    %cst_23 = arith.constant dense<0xFF800000> : vector<16xf32>
    %46 = vector.multi_reduction <maximumf>, %45, %cst_23 [1] : vector<16x20xf32> to vector<16xf32>
    %47 = vector.shape_cast %46 : vector<16xf32> to vector<16x1xf32>
    %48 = vector.broadcast %47 : vector<16x1xf32> to vector<16x20xf32>
    %49 = arith.subf %45, %48 : vector<16x20xf32>
    %50 = math.exp %49 : vector<16x20xf32>
    %cst_24 = arith.constant dense<0.000000e+00> : vector<16xf32>
    %51 = vector.multi_reduction <add>, %50, %cst_24 [1] : vector<16x20xf32> to vector<16xf32>
    %52 = vector.shape_cast %51 : vector<16xf32> to vector<16x1xf32>
    %53 = tpu.reciprocal %52 {approx = true} : vector<16x1xf32> -> vector<16x1xf32>
    %54 = vector.broadcast %53 : vector<16x1xf32> to vector<16x20xf32>
    %55 = arith.mulf %50, %54 : vector<16x20xf32>
    %cst_25 = arith.constant dense<0.000000e+00> : vector<16x8xf32>
    %56 = tpu.matmul %55, %44, %cst_25 {dimension_numbers = #tpu.dot_dimension_numbers<[1], [0], [0], [1], [0, 0, 1, 1], [], []>} : vector<16x20xf32>, vector<20x8xf32>, vector<16x8xf32> -> vector<16x8xf32>
    %57 = vector.extract_strided_slice %11 {offsets = [0, 24], sizes = [16, 8], strides = [1, 1]} : vector<16x32xf32> to vector<16x8xf32>
    %58 = vector.extract_strided_slice %8 {offsets = [0, 24], sizes = [20, 8], strides = [1, 1]} : vector<20x32xf32> to vector<20x8xf32>
    %59 = vector.extract_strided_slice %9 {offsets = [0, 24], sizes = [20, 8], strides = [1, 1]} : vector<20x32xf32> to vector<20x8xf32>
    %cst_26 = arith.constant dense<0.000000e+00> : vector<16x20xf32>
    %60 = tpu.matmul %57, %58, %cst_26 {dimension_numbers = #tpu.dot_dimension_numbers<[1], [1], [0], [0], [0, 0, 1, 0], [], []>} : vector<16x8xf32>, vector<20x8xf32>, vector<16x20xf32> -> vector<16x20xf32>
    %cst_27 = arith.constant dense<0xFF800000> : vector<16xf32>
    %61 = vector.multi_reduction <maximumf>, %60, %cst_27 [1] : vector<16x20xf32> to vector<16xf32>
    %62 = vector.shape_cast %61 : vector<16xf32> to vector<16x1xf32>
    %63 = vector.broadcast %62 : vector<16x1xf32> to vector<16x20xf32>
    %64 = arith.subf %60, %63 : vector<16x20xf32>
    %65 = math.exp %64 : vector<16x20xf32>
    %cst_28 = arith.constant dense<0.000000e+00> : vector<16xf32>
    %66 = vector.multi_reduction <add>, %65, %cst_28 [1] : vector<16x20xf32> to vector<16xf32>
    %67 = vector.shape_cast %66 : vector<16xf32> to vector<16x1xf32>
    %68 = tpu.reciprocal %67 {approx = true} : vector<16x1xf32> -> vector<16x1xf32>
    %69 = vector.broadcast %68 : vector<16x1xf32> to vector<16x20xf32>
    %70 = arith.mulf %65, %69 : vector<16x20xf32>
    %cst_29 = arith.constant dense<0.000000e+00> : vector<16x8xf32>
    %71 = tpu.matmul %70, %59, %cst_29 {dimension_numbers = #tpu.dot_dimension_numbers<[1], [0], [0], [1], [0, 0, 1, 1], [], []>} : vector<16x20xf32>, vector<20x8xf32>, vector<16x8xf32> -> vector<16x8xf32>
    %72 = tpu.concatenate %26, %41, %56, %71 in 1 : vector<16x8xf32>, vector<16x8xf32>, vector<16x8xf32>, vector<16x8xf32> -> vector<16x32xf32>
    %c0_30 = arith.constant 0 : index
    %c0_31 = arith.constant 0 : index
    %c0_32 = arith.constant 0 : index
    %73 = vector.load %arg6[%c0_30, %c0_31, %c0_32] : memref<1x16x32xf32, #tpu.memory_space<vmem>>, vector<1x16x32xf32>
    %74 = vector.shape_cast %73 : vector<1x16x32xf32> to vector<16x32xf32>
    %75 = vector.shape_cast %72 : vector<16x32xf32> to vector<1x16x32xf32>
    tpu.vector_store %arg6[%c0_30, %c0_31, %c0_32], %75 {strides = array<i32>} : memref<1x16x32xf32, #tpu.memory_space<vmem>>, vector<1x16x32xf32>,
    return
  }
  func.func @transform_0(%arg0: i32) -> (i32, i32, i32) {
    %c0_i32 = arith.constant 0 : i32
    %c0_i32_0 = arith.constant 0 : i32
    %c0_i32_1 = arith.constant 0 : i32
    return %arg0, %c0_i32, %c0_i32_0 : i32, i32, i32
  }
  func.func @transform_1(%arg0: i32) -> (i32, i32, i32) {
    %c0_i32 = arith.constant 0 : i32
    %c0_i32_0 = arith.constant 0 : i32
    %c0_i32_1 = arith.constant 0 : i32
    return %arg0, %c0_i32, %c0_i32_0 : i32, i32, i32
  }
  func.func @transform_2(%arg0: i32) -> (i32, i32, i32) {
    %c0_i32 = arith.constant 0 : i32
    %c0_i32_0 = arith.constant 0 : i32
    %c0_i32_1 = arith.constant 0 : i32
    return %arg0, %c0_i32, %c0_i32_0 : i32, i32, i32
  }
  func.func @transform_3(%arg0: i32) -> (i32, i32) {
    %c0_i32 = arith.constant 0 : i32
    %c0_i32_0 = arith.constant 0 : i32
    %c0_i32_1 = arith.constant 0 : i32
    return %c0_i32, %c0_i32_0 : i32, i32
  }
  func.func @transform_4(%arg0: i32) -> (i32, i32) {
    %c0_i32 = arith.constant 0 : i32
    %c0_i32_0 = arith.constant 0 : i32
    %c0_i32_1 = arith.constant 0 : i32
    return %c0_i32, %c0_i32_0 : i32, i32
  }
  func.func @transform_5(%arg0: i32) -> (i32, i32, i32) {
    %c0_i32 = arith.constant 0 : i32
    %c0_i32_0 = arith.constant 0 : i32
    %c0_i32_1 = arith.constant 0 : i32
    return %arg0, %c0_i32, %c0_i32_0 : i32, i32, i32
  }
}

</mosaic_0001>

<bundles_post_ra>
// kernel: tpu_custom_call.1
= control target key start
LH: loop header
LB: loop body
LE: loop exit
PB: predicated region body
PF: predicated region fallthrough
CT: control target
= control target key end

     0   :  { %10 = vsyncpa [#allocation3], 0  ;;  %s2241_s0 = inlined_call_operand.vmem [shape: f32[2,16,32], index: 0, kind: input, shape index: {}]   ;;  %s2242_s1 = inlined_call_operand.vmem [shape: f32[2,16,32], index: 1, kind: input, shape index: {}]   ;;  %s2243_s2 = inlined_call_operand.hbm [shape: f32[2,16,32], index: 2, kind: input, shape index: {}]   ;;  %s2244_s3 = inlined_call_operand.vmem [shape: f32[20,16], index: 3, kind: input, shape index: {}]   ;;  %s2245_s4 = inlined_call_operand.vmem [shape: f32[20,16], index: 4, kind: input, shape index: {}]   ;;  %s2246_s5 = inlined_call_operand.hbm [shape: f32[2,16,32], index: 5, kind: output, shape index: {}]  }
   0x1   :  { %12 = vsyncpa [#allocation3 + $0x1], 0 }
   0x2   :  { %13 = vsyncpa [#allocation4], 0 }
   0x3   :  { %15 = vsyncpa [#allocation4 + $0x1], 0  ;;  %s1880_s18 = smov 0   ;;  %s1882_s19 = smov 0  }
   0x4   :  { %s1884_s20 = smov 0   ;;  %s1886_s21 = smov 0  }
   0x5 LB: > { %s1901_s22 = sadd.s32 4294967295, %s1835_s21   ;;  %s1446_s23 = sadd.s32 4294967294, %s1835_s21   ;;  %s1835_s21 = sphi %s1886_s21, %s2261_s21   ;;  %s1831_s20 = sphi %s1884_s20, %s2260_s20   ;;  %s1827_s19 = sphi %s1882_s19, %s2259_s19   ;;  %s1823_s18 = sphi %s1880_s18, %s2258_s18  }
   0x6   : > { %s1905_s24 = sadd.s32 1, %s1835_s21   ;;  %s80_s25 = sadd.s32 1, %s1831_s20 }
   0x7   : > { %s77_s26 = ssub.s32 %s1835_s21, %s1905_s24  ;;  %p87_p0 = scmp.ne.s32.totalorder %s1831_s20, %s1827_s19 }
   0x8   : > { %p78_p1 = scmp.eq.s32.totalorder %s77_s26, 0  ;;  %p88_p2 = scmp.eq.s32.totalorder %s1835_s21, 0 }
   0x9   : > { %p93_p3 = scmp.ne.s32.totalorder %s1827_s19, %s1823_s18  ;;  %p94_p4 = scmp.eq.s32.totalorder %s1901_s22, 0 }
   0xa   : > { %s1917_s27 = scalar_select %p78_p1, %s1831_s20, %s80_s25  }
   0xb   : > { %p1919_p5 = por %p88_p2, %p87_p0  ;;  %p1923_p6 = por %p94_p4, %p93_p3 }
   0xc   : > { %p159_p7 = scmp.eq.s32.totalorder %s1901_s22, 1  ;;  %p165_p8 = scmp.eq.s32.totalorder %s1446_s23, 1 }
   0xd   : > { %s2250_s29 = scalar_select %p1923_p6, 1, 0 }
   0xe   : > { %p1666_p10 = scmp.lt.s32.totalorder %s1835_s21, 2  ;;  %p1930_p11 = por %p159_p7, %p87_p0 }
   0xf   : > { %p1934_p12 = por %p165_p8, %p93_p3  ;;  %s207_s7 = sand.u32 1, %s1831_s20  }
  0x10   : > { %s2251_s30 = scalar_select %p1930_p11, 1, 0 }
  0x11   : > { %s2252_s6 = scalar_select %p1934_p12, 1, 0 }
  0x12   : > { %s1502_s8 = sshll.u32 %s1835_s21, 8  ;;  %s1449_s9 = sshll.u32 %s207_s7, 4 }
  0x13   : > { %s1943_s12 = scalar_lea.hbm %s2243_s2, %s1502_s8  ;;  %s211_s13 = scalar_lea.vmem [#allocation2], %s1449_s9 }
  0x14   : > { %s218_s14 = sshll.u32 %s211_s13, 4  ;;  %p1947_p13 = pnand %p1666_p10, %p1919_p5  ;;  %s1951_s14 = int_to_ptr.vmem [resolvable:$true] %s218_s14 }
  0x15   : > { %s1953_s16 = scalar_lea.sflag [#allocation3], %s207_s7  ;;  %s1743_s17 = scalar_lea.hbm %s1943_s12, 256 }
  0x16   : > { %p1744_p0 = scmp.ne.s32.totalorder %s1943_s12, %s1743_s17  ;;  %p1745_p1 = pneg %p1947_p13 }
  0x17   : > { %s1748_s26 = scalar_lea.hbm %s2243_s2, 512  ;;  %p1749_p4 = scmp.lt.s32.totalorder %s1943_s12, %s2243_s2 }
  0x18   : > { %p1746_p2 = pnand %p1745_p1, %p1744_p0  ;;  %p1750_p5 = scmp.lt.s32.totalorder %s1748_s26, %s1743_s17 }
  0x1a   : > { %p1747_p3 = pneg %p1746_p2  ;;  %p1751_p7 = por %p1750_p5, %p1749_p4 }
  0x1c   : > { %p1752_p8 = pnand %p1751_p7, %p1747_p3 }
  0x1e   : > { %1755 = shalt.err (!%p1752_p8)
}
  0x1f   : > { %s1756_s7 = scalar_lea.vmem %s1951_s14, 256  ;;  %s1837_s9 = smov [#allocation2]  }
  0x20   : > { %p1757_p10 = scmp.ne.s32.totalorder %s1951_s14, %s1756_s7  ;;  %s1761_s10 = sshll.u32 %s1837_s9, 4  ;;  %s1762_s10 = int_to_ptr.vmem [resolvable:$false] %s1761_s10 }
  0x21   : > { %s1763_s11 = scalar_lea.vmem %s1762_s10, 512  ;;  %p1764_p2 = scmp.lt.s32.totalorder %s1951_s14, %s1762_s10 }
  0x22   : > { %p1759_p9 = pnand %p1757_p10, %p1745_p1  ;;  %p1765_p12 = scmp.lt.s32.totalorder %s1763_s11, %s1756_s7 }
  0x24   : > { %p1760_p0 = pneg %p1759_p9  ;;  %p1766_p11 = por %p1765_p12, %p1764_p2 }
  0x26   : > { %p1767_p6 = pnand %p1766_p11, %p1760_p0 }
  0x28   : > { %1770 = shalt.err (!%p1767_p6)
}
  0x29   : > { %s1838_s13 = smov 128   ;;  %s1839_s17 = smov 8  }
  0x2a   : > { %1661 = dma.hbm_to_vmem [thread:$0]  (!%p1947_p13), %s1943_s12, 256, %s1951_s14, %s1953_s16, %s1838_s13, %s1838_s13, %s1839_s17  }
  0x2b   : > { %p1452_p9 = scmp.ge.s32.totalorder %s1835_s21, 1  ;;  %p226_p1 = scmp.lt.s32.totalorder %s1835_s21, 3 }
  0x2d   : > { %p227_p3 = pnand %p1452_p9, %p226_p1 }
  0x2e   : > { %s1977_s23 = sand.u32 (!%p227_p3), 1, %s1827_s19   ;;  %p2254_p6 = scmp.ne.s32.totalorder (!%p227_p3), %s2250_s29, 0 }
  0x2f   : > { %230 = sbr.rel (%p227_p3) target bundleno = 2264 (0x8d8), region = 40  ;;  %s1453_s25 = sshll.u32 (!%p227_p3), %s1977_s23, 4 }
  0x30   : > { %s233_s26 = scalar_lea.sflag (!%p227_p3), [#allocation3], %s1977_s23  ;;  %s1983_s28 = scalar_lea.vmem (!%p227_p3), [#allocation2], %s1453_s25 }
  0x34   : > { %1814 = dma.done.wait (%p2254_p6), %s233_s26, 256  }
  0x35   : > { %1816 = vsyncadd (%p2254_p6), %s233_s26, 4294967040  ;;  %p273_p11 = scmp.lt.s32.totalorder %s1901_s22, 1  ;;  %v1840_v0 = vmov 0.0   ;;  %vm1841_vm0 = vmmov 0   ;;  %v289_v3 = vld [vmem:[%s2244_s3] sm:$0xff]  ;;  %vm295_vm1 = vcmask 130048  }
  0x36   : > { %1556 = vmatprep.subr.mxu0 %v1840_v0  ;;  %1560 = vmatprep.mubr.msk.f32.mxu0 %vm1841_vm0, %v1840_v0  ;;  %v290_v4 = vld [vmem:[%s2244_s3 + $0x8] sm:$0xff]  ;;  %v291_v5 = vld [vmem:[%s2244_s3 + $0x10] sm:$0xf]  ;;  %vm476_vm2 = vcmask 64512   ;;  %s1842_s15 = smov 120   ;;  %v292_v17 = vld [vmem:[%s2245_s4] sm:$0xff] }
  0x37   : > { %s274_s12 = scalar_select %p273_p11, %s1901_s22, 1  ;;  %1569 = vmatprep.subr.mxu1 %v1840_v0  ;;  %1573 = vmatprep.mubr.msk.f32.mxu1 %vm1841_vm0, %v1840_v0  ;;  %v288_v13 = vld [vmem:[%s1983_s28 + $0x8] sm:$0xff]  ;;  %v287_v14 = vld [vmem:[%s1983_s28] sm:$0xff]  ;;  %vm567_vm3 = vcmask 162816   ;;  %vm596_vm4 = vcmask 1043456   ;;  %vm1329_vm5 = vcmask 195584  }
  0x38   : > { %1570 = vmatpush3.msra.mxu1 %v288_v13  ;;  %v293_v19 = vld [vmem:[%s2245_s4 + $0x8] sm:$0xff]  ;;  %v294_v20 = vld [vmem:[%s2245_s4 + $0x10] sm:$0xf]  ;;  %s1843_s9 = smov 112   ;;  %s1844_s10 = smov 104   ;;  %vm1332_vm6 = vcmask 261120  }
  0x39   : > { %s1503_s14 = sshll.u32 %s274_s12, 4  ;;  %1571 = vmatprep.subr.mxu1 %v1840_v0  ;;  %s1845_s11 = smov 8  }
  0x3a   : > { %s282_s8 = scalar_lea.vmem %s2242_s1, %s1503_s14  ;;  %s277_s12 = scalar_lea.vmem %s2241_s0, %s1503_s14  ;;  %1572 = vmatpush3.msra.mxu1 %v287_v14 }
  0x3b   : > { %v286_v1 = vld [vmem:[%s282_s8 + $0x8] sm:$0xff]  ;;  %v285_v2 = vld [vmem:[%s282_s8] sm:$0xff]  ;;  %1574 = vmatmul.mubr.msk.f32.vlgmr.msra.gmra.mxu1 %vm295_vm1, %v292_v17  ;;  %s1846_s13 = smov 16   ;;  %s1847_s17 = smov 24  }
  0x3c   : > { %1557 = vmatpush3.msra.mxu0 %v286_v1  ;;  %v283_v6 = vld [vmem:[%s277_s12] sm:$0xff]  ;;  %v284_v15 = vld [vmem:[%s277_s12 + $0x8] sm:$0xff]  ;;  %1576 = vmatprep.mubr.msk.f32.mxu1 %vm1841_vm0, %v1840_v0  ;;  %s272_s26 = scalar_lea.vmem [#allocation5], %s1453_s25  ;;  %s1336_s16 = scalar_lea.sflag [#allocation4], %s1977_s23 }
  0x3d   : > { %1558 = vmatprep.subr.mxu0 %v1840_v0  ;;  %v2013_v7 = vmul.f32 0.35355338, %v283_v6  ;;  %v2040_v18 = vmul.f32 0.35355338, %v284_v15  ;;  %s1349_s12 = sshll.u32 %s272_s26, 4  ;;  %p2255_p13 = scmp.ne.s32.totalorder %s2251_s30, 0  ;;  %s2191_s12 = int_to_ptr.vmem [resolvable:$true] %s1349_s12 }
  0x3e   : > { %1559 = vmatpush3.msra.mxu0 %v285_v2  ;;  %s1771_s28 = scalar_lea.vmem %s2191_s12, 256  ;;  %s1848_s8 = smov [#allocation5]  }
  0x3f   : > { %1561 = vmatmul.mubr.msk.f32.vlgmr.msra.gmra.mxu0 %vm295_vm1, %v289_v3  ;;  %1577 = vmatmul.mubr.msk.f32.gmra.mxu1 %vm295_vm1, %v293_v19  ;;  %p1772_p12 = scmp.ne.s32.totalorder %s2191_s12, %s1771_s28  ;;  %s1775_s29 = sshll.u32 %s1848_s8, 4  ;;  %s1776_s29 = int_to_ptr.vmem [resolvable:$false] %s1775_s29 }
  0x40   : > { %1563 = vmatprep.mubr.msk.f32.mxu0 %vm1841_vm0, %v1840_v0  ;;  %1579 = vmatprep.mubr.msk.f32.mxu1 %vm1841_vm0, %v1840_v0  ;;  %s1777_s7 = scalar_lea.vmem %s1776_s29, 512  ;;  %p1778_p7 = scmp.lt.s32.totalorder %s2191_s12, %s1776_s29 }
  0x41   : > { %p1773_p4 = pnand %p1772_p12, %p2255_p13  ;;  %p1779_p8 = scmp.lt.s32.totalorder %s1777_s7, %s1771_s28 }
  0x43   : > { %1564 = vmatmul.mubr.msk.f32.gmra.mxu0 %vm295_vm1, %v290_v4  ;;  %1580 = vmatmul.mubr.msk.f32.gmra.mxu1 %vm295_vm1, %v294_v20  ;;  %p1774_p5 = pneg %p1773_p4  ;;  %p1780_p10 = por %p1779_p8, %p1778_p7 }
  0x44   : > { %1566 = vmatprep.mubr.msk.f32.mxu0 %vm1841_vm0, %v1840_v0 }
  0x45   : > { %p1781_p0 = pnand %p1780_p10, %p1774_p5 }
  0x47   : > { %1567 = vmatmul.mubr.msk.f32.gmra.mxu0 %vm295_vm1, %v291_v5 }
  0x48   : > { %1588 = vmatprep.mubr.msk.f32.mxu0 %vm476_vm2, %v2013_v7 }
  0xfb   : > { %v2073_v26 = vpop.f32.mrf.mxu1 }
  0xfd   : > { %v1575_v27 = vpop.f32.mrf.mxu1 }
  0xff   : > { %v2017_v8 = vpop.f32.mrf.mxu0  ;;  %v2075_v28 = vpop.f32.mrf.mxu1 }
 0x100   : > { %679 = vrot.lane.b32.xlu1 %v2017_v8, %s1842_s15 }
 0x101   : > { %v1562_v9 = vpop.f32.mrf.mxu0  ;;  %v1578_v29 = vpop.f32.mrf.mxu1 }
 0x103   : > { %v2021_v10 = vpop.f32.mrf.mxu0  ;;  %v2079_v34 = vpop.f32.mrf.mxu1 }
 0x104   : > { %675 = vrot.lane.b32.xlu1 %v2013_v7, %s1842_s15  ;;  %1591 = vmatprep.subr.msk.mxu1 %vm596_vm4, %v2079_v34 }
 0x105   : > { %v1565_v11 = vpop.f32.mrf.mxu0  ;;  %v1581_v35 = vpop.f32.mrf.mxu1  ;;  %1592 = vmatpush3.msk.msra.mxu1 %vm596_vm4, %v2079_v34 }
 0x106   : > { %1593 = vmatprep.subr.mxu1 %v2075_v28 }
 0x107   : > { %v2025_v12 = vpop.f32.mrf.mxu0  ;;  %1594 = vmatpush3.msra.mxu1 %v2075_v28 }
 0x108   : > { %683 = vrot.lane.b32.xlu0 %v2025_v12, %s1842_s15  ;;  %1582 = vmatprep.subr.msk.mxu0 %vm476_vm2, %v2025_v12 }
 0x109   : > { %v1568_v16 = vpop.f32.mrf.mxu0  ;;  %1583 = vmatpush3.xpose.msk.msra.mxu0 %vm476_vm2, %v2025_v12  ;;  %1595 = vmatprep.subr.mxu1 %v2073_v26 }
 0x10a   : > { %1584 = vmatprep.subr.msk.mxu0 %vm476_vm2, %v2021_v10  ;;  %1596 = vmatpush3.msra.mxu1 %v2073_v26 }
 0x10c   : > { %681 = vrot.lane.b32.xlu0 %v2021_v10, %s1842_s15 }
 0x10d   : > { %1585 = vmatpush3.xpose.msk.msra.mxu0 %vm476_vm2, %v2021_v10 }
 0x10e   : > { %1586 = vmatprep.subr.msk.mxu0 %vm476_vm2, %v2017_v8 }
 0x110   : > { %677 = vrot.lane.b32.xlu0 %v2040_v18, %s1842_s15 }
 0x111   : > { %1587 = vmatpush3.xpose.msk.msra.mxu0 %vm476_vm2, %v2017_v8 }
 0x114   : > { %1589 = vmatmul.mubr.msk.f32.vlgmr.msra.gmra.mxu0 %vm476_vm2, %v2040_v18 }
 0x172   : > { %v680_v21 = vpop.permute.xlu1 %679 }
 0x176   : > { %v676_v22 = vpop.permute.xlu1 %675 }
 0x177   : > { %1606 = vmatprep.mubr.msk.f32.mxu0 %vm476_vm2, %v676_v22 }
 0x17a   : > { %v684_v23 = vpop.permute.xlu0 %683 }
 0x17b   : > { %1600 = vmatprep.subr.msk.mxu0 %vm476_vm2, %v684_v23 }
 0x17c   : > { %1601 = vmatpush3.xpose.msk.msra.mxu0 %vm476_vm2, %v684_v23 }
 0x17e   : > { %v682_v24 = vpop.permute.xlu0 %681 }
 0x17f   : > { %1602 = vmatprep.subr.msk.mxu0 %vm476_vm2, %v682_v24 }
 0x180   : > { %1603 = vmatpush3.xpose.msk.msra.mxu0 %vm476_vm2, %v682_v24 }
 0x181   : > { %1604 = vmatprep.subr.msk.mxu0 %vm476_vm2, %v680_v21 }
 0x182   : > { %v678_v25 = vpop.permute.xlu0 %677 }
 0x184   : > { %1605 = vmatpush3.xpose.msk.msra.mxu0 %vm476_vm2, %v680_v21 }
 0x187   : > { %1607 = vmatmul.mubr.msk.f32.vlgmr.msra.gmra.mxu0 %vm476_vm2, %v678_v25 }
 0x1d4   : > { %v1590_v30 = vpop.f32.mrf.mxu0 }
 0x1d5   : > { %v571_v31 = vsel %vm567_vm3, %v1590_v30, -inf }
 0x1d6   : > { %572 = vmax.xlane.f32.xlu0 %v571_v31  ;;  %v558_v32 = vpop.f32.mrf.mxu0 }
 0x1d7   : > { %v568_v33 = vsel %vm567_vm3, %v558_v32, -inf }
 0x1d8   : > { %569 = vmax.xlane.f32.xlu1 %v568_v33 }
 0x247   : > { %v1608_v36 = vpop.f32.mrf.mxu0 }
 0x248   : > { %v773_v37 = vsel %vm567_vm3, %v1608_v36, -inf }
 0x249   : > { %v761_v38 = vpop.f32.mrf.mxu0  ;;  %774 = vmax.xlane.f32.xlu1 %v773_v37 }
 0x24a   : > { %v770_v39 = vsel %vm567_vm3, %v761_v38, -inf }
 0x24b   : > { %771 = vmax.xlane.f32.xlu0 %v770_v39 }
 0x25a   : > { %796 = vrot.lane.b32.xlu1 %v2075_v28, %s1842_s15 }
 0x25e   : > { %794 = vrot.lane.b32.xlu1 %v2073_v26, %s1842_s15 }
 0x25f   : > { %v573_v41 = vpop.xlane.xlu0 %572 }
 0x260   : > { %v575_v43 = vsub.f32 %v1590_v30, %v573_v41 }
 0x261   : > { %798 = vrot.lane.b32.xlu0 %v2079_v34, %s1842_s15  ;;  %v570_v40 = vpop.xlane.xlu1 %569  ;;  %s1505_s15 = sshll.u32 %s1901_s22, 8 }
 0x262   : > { %v574_v42 = vsub.f32 %v558_v32, %v570_v40  ;;  %v578_v45 = vmul.f32 1.442695, %v575_v43  ;;  %s2197_s22 = scalar_lea.hbm %s2246_s5, %s1505_s15 }
 0x264   : > { %v576_v44 = vmul.f32 1.442695, %v574_v42 }
 0x266   : > { %1711 = vpow2.f32 %v576_v44 }
 0x267   : > { %1713 = vpow2.f32 %v578_v45 }
 0x273   : > { %v1712_v46 = vpop.eup %1711 }
 0x274   : > { %v1714_v47 = vpop.eup %1713  ;;  %v580_v48 = vsel %vm567_vm3, %v1712_v46, 0.0 }
 0x275   : > { %v583_v49 = vsel %vm567_vm3, %v1714_v47, 0.0 }
 0x280   : > { %581 = vadd.xlane.f32.xlu0 %v580_v48 }
 0x282   : > { %584 = vadd.xlane.f32.xlu1 %v583_v49 }
 0x2d2   : > { %v775_v50 = vpop.xlane.xlu1 %774 }
 0x2d3   : > { %v777_v51 = vsub.f32 %v1608_v36, %v775_v50 }
 0x2d4   : > { %v772_v52 = vpop.xlane.xlu0 %771 }
 0x2d5   : > { %v780_v53 = vmul.f32 1.442695, %v777_v51  ;;  %v776_v54 = vsub.f32 %v761_v38, %v772_v52 }
 0x2d6   : > { %v797_v61 = vpop.permute.xlu1 %796 }
 0x2d7   : > { %1715 = vpow2.f32 %v780_v53  ;;  %v778_v55 = vmul.f32 1.442695, %v776_v54 }
 0x2d8   : > { %v799_v56 = vpop.permute.xlu0 %798 }
 0x2d9   : > { %1717 = vpow2.f32 %v778_v55  ;;  %1609 = vmatprep.subr.msk.mxu1 %vm596_vm4, %v799_v56 }
 0x2da   : > { %v795_v62 = vpop.permute.xlu1 %794 }
 0x2e4   : > { %v1716_v57 = vpop.eup %1715 }
 0x2e5   : > { %v785_v58 = vsel %vm567_vm3, %v1716_v57, 0.0 }
 0x2e6   : > { %v1718_v59 = vpop.eup %1717  ;;  %786 = vadd.xlane.f32.xlu1 %v785_v58 }
 0x2e7   : > { %v782_v60 = vsel %vm567_vm3, %v1718_v59, 0.0 }
 0x2e8   : > { %783 = vadd.xlane.f32.xlu0 %v782_v60 }
 0x2f7   : > { %891 = vrot.lane.b32.xlu1 %v2021_v10, %s1843_s9 }
 0x2fb   : > { %885 = vrot.lane.b32.xlu1 %v2013_v7, %s1843_s9 }
 0x2fe   : > { %893 = vrot.lane.b32.xlu0 %v2025_v12, %s1843_s9 }
 0x302   : > { %889 = vrot.lane.b32.xlu0 %v2017_v8, %s1843_s9 }
 0x306   : > { %887 = vrot.lane.b32.xlu0 %v2040_v18, %s1843_s9 }
 0x309   : > { %v582_v63 = vpop.xlane.xlu0 %581 }
 0x30a   : > { %1719 = vrcp.f32 %v582_v63 }
 0x30b   : > { %v585_v0 = vpop.xlane.xlu1 %584 }
 0x30c   : > { %1721 = vrcp.f32 %v585_v0 }
 0x317   : > { %v1720_v1 = vpop.eup %1719 }
 0x318   : > { %v588_v2 = vmul.f32 %v1720_v1, %v1712_v46 }
 0x319   : > { %v1722_v3 = vpop.eup %1721 }
 0x31a   : > { %v589_v4 = vmul.f32 %v1722_v3, %v1714_v47  ;;  %1597 = vmatprep.mubr.msk.f32.mxu1 %vm567_vm3, %v588_v2 }
 0x31c   : > { %1598 = vmatmul.mubr.msk.f32.vlgmr.msra.gmra.mxu1 %vm567_vm3, %v589_v4 }
 0x31d   : > { %1610 = vmatpush3.msk.msra.mxu1 %vm596_vm4, %v799_v56 }
 0x31e   : > { %1611 = vmatprep.subr.mxu1 %v797_v61 }
 0x31f   : > { %1612 = vmatpush3.msra.mxu1 %v797_v61 }
 0x320   : > { %1613 = vmatprep.subr.mxu1 %v795_v62 }
 0x321   : > { %1614 = vmatpush3.msra.mxu1 %v795_v62 }
 0x36f   : > { %v787_v5 = vpop.xlane.xlu1 %786 }
 0x370   : > { %1723 = vrcp.f32 %v787_v5 }
 0x371   : > { %v784_v6 = vpop.xlane.xlu0 %783 }
 0x372   : > { %1725 = vrcp.f32 %v784_v6 }
 0x373   : > { %v892_v11 = vpop.permute.xlu1 %891 }
 0x375   : > { %v894_v9 = vpop.permute.xlu0 %893 }
 0x376   : > { %1618 = vmatprep.subr.msk.mxu1 %vm476_vm2, %v894_v9 }
 0x377   : > { %v886_v17 = vpop.permute.xlu1 %885 }
 0x379   : > { %v890_v19 = vpop.permute.xlu0 %889 }
 0x37d   : > { %v1724_v13 = vpop.eup %1723  ;;  %v888_v20 = vpop.permute.xlu0 %887 }
 0x37e   : > { %v791_v16 = vmul.f32 %v1724_v13, %v1716_v57 }
 0x37f   : > { %v1726_v14 = vpop.eup %1725 }
 0x380   : > { %v790_v15 = vmul.f32 %v1726_v14, %v1718_v59 }
 0x382   : > { %1615 = vmatprep.mubr.msk.f32.mxu1 %vm567_vm3, %v790_v15 }
 0x383   : > { %1616 = vmatmul.mubr.msk.f32.vlgmr.msra.gmra.mxu1 %vm567_vm3, %v791_v16 }
 0x384   : > { %1619 = vmatpush3.xpose.msk.msra.mxu1 %vm476_vm2, %v894_v9  ;;  %1624 = vmatprep.mubr.msk.f32.mxu1 %vm476_vm2, %v886_v17 }
 0x385   : > { %1620 = vmatprep.subr.msk.mxu1 %vm476_vm2, %v892_v11 }
 0x388   : > { %1621 = vmatpush3.xpose.msk.msra.mxu1 %vm476_vm2, %v892_v11 }
 0x389   : > { %1622 = vmatprep.subr.msk.mxu1 %vm476_vm2, %v890_v19 }
 0x38c   : > { %1623 = vmatpush3.xpose.msk.msra.mxu1 %vm476_vm2, %v890_v19 }
 0x38f   : > { %1625 = vmatmul.mubr.msk.f32.vlgmr.msra.gmra.mxu1 %vm476_vm2, %v888_v20 }
 0x3dc   : > { %v2125_v21 = vpop.f32.mrf.mxu1 }
 0x3de   : > { %v2127_v22 = vpop.f32.mrf.mxu1 }
 0x443   : > { %v2129_v23 = vpop.f32.mrf.mxu1 }
 0x445   : > { %v2131_v24 = vpop.f32.mrf.mxu1 }
 0x44f   : > { %v1626_v25 = vpop.f32.mrf.mxu1 }
 0x450   : > { %v983_v27 = vsel %vm567_vm3, %v1626_v25, -inf }
 0x451   : > { %984 = vmax.xlane.f32.xlu0 %v983_v27  ;;  %v971_v29 = vpop.f32.mrf.mxu1 }
 0x452   : > { %v980_v30 = vsel %vm567_vm3, %v971_v29, -inf }
 0x453   : > { %981 = vmax.xlane.f32.xlu1 %v980_v30 }
 0x464   : > { %1004 = vrot.lane.b32.xlu1 %v2075_v28, %s1843_s9 }
 0x467   : > { %1006 = vrot.lane.b32.xlu0 %v2079_v34, %s1843_s9 }
 0x468   : > { %1002 = vrot.lane.b32.xlu1 %v2073_v26, %s1843_s9 }
 0x4da   : > { %v985_v31 = vpop.xlane.xlu0 %984 }
 0x4db   : > { %v987_v32 = vsub.f32 %v1626_v25, %v985_v31 }
 0x4dc   : > { %v982_v33 = vpop.xlane.xlu1 %981 }
 0x4dd   : > { %v990_v35 = vmul.f32 1.442695, %v987_v32  ;;  %v986_v36 = vsub.f32 %v971_v29, %v982_v33 }
 0x4de   : > { %v1007_v37 = vpop.permute.xlu0 %1006 }
 0x4df   : > { %1727 = vpow2.f32 %v990_v35  ;;  %v988_v38 = vmul.f32 1.442695, %v986_v36  ;;  %1627 = vmatprep.subr.msk.mxu0 %vm596_vm4, %v1007_v37 }
 0x4e0   : > { %1628 = vmatpush3.msk.msra.mxu0 %vm596_vm4, %v1007_v37  ;;  %v1005_v39 = vpop.permute.xlu1 %1004 }
 0x4e1   : > { %1729 = vpow2.f32 %v988_v38  ;;  %1629 = vmatprep.subr.mxu0 %v1005_v39 }
 0x4e2   : > { %1630 = vmatpush3.msra.mxu0 %v1005_v39 }
 0x4e4   : > { %v1003_v40 = vpop.permute.xlu1 %1002 }
 0x4e5   : > { %1631 = vmatprep.subr.mxu0 %v1003_v40 }
 0x4e6   : > { %1632 = vmatpush3.msra.mxu0 %v1003_v40 }
 0x4ec   : > { %v1728_v41 = vpop.eup %1727 }
 0x4ed   : > { %v995_v42 = vsel %vm567_vm3, %v1728_v41, 0.0 }
 0x4ee   : > { %v1730_v43 = vpop.eup %1729  ;;  %996 = vadd.xlane.f32.xlu1 %v995_v42 }
 0x4ef   : > { %v992_v44 = vsel %vm567_vm3, %v1730_v43, 0.0 }
 0x4f0   : > { %993 = vadd.xlane.f32.xlu0 %v992_v44 }
 0x4ff   : > { %1099 = vrot.lane.b32.xlu1 %v2021_v10, %s1844_s10 }
 0x503   : > { %1093 = vrot.lane.b32.xlu1 %v2013_v7, %s1844_s10 }
 0x506   : > { %1101 = vrot.lane.b32.xlu0 %v2025_v12, %s1844_s10 }
 0x50a   : > { %1097 = vrot.lane.b32.xlu0 %v2017_v8, %s1844_s10 }
 0x50e   : > { %1095 = vrot.lane.b32.xlu0 %v2040_v18, %s1844_s10 }
 0x577   : > { %v997_v45 = vpop.xlane.xlu1 %996 }
 0x578   : > { %1731 = vrcp.f32 %v997_v45 }
 0x579   : > { %v994_v46 = vpop.xlane.xlu0 %993 }
 0x57a   : > { %1733 = vrcp.f32 %v994_v46 }
 0x57b   : > { %v1100_v10 = vpop.permute.xlu1 %1099 }
 0x57d   : > { %v1102_v47 = vpop.permute.xlu0 %1101 }
 0x57e   : > { %1636 = vmatprep.subr.msk.mxu0 %vm476_vm2, %v1102_v47 }
 0x57f   : > { %v1094_v51 = vpop.permute.xlu1 %1093 }
 0x581   : > { %v1098_v8 = vpop.permute.xlu0 %1097 }
 0x585   : > { %v1732_v48 = vpop.eup %1731  ;;  %v1096_v12 = vpop.permute.xlu0 %1095 }
 0x586   : > { %v1001_v50 = vmul.f32 %v1732_v48, %v1728_v41 }
 0x587   : > { %v1734_v49 = vpop.eup %1733 }
 0x588   : > { %v1000_v7 = vmul.f32 %v1734_v49, %v1730_v43 }
 0x58a   : > { %1633 = vmatprep.mubr.msk.f32.mxu0 %vm567_vm3, %v1000_v7 }
 0x58b   : > { %1634 = vmatmul.mubr.msk.f32.vlgmr.msra.gmra.mxu0 %vm567_vm3, %v1001_v50 }
 0x58c   : > { %1637 = vmatpush3.xpose.msk.msra.mxu0 %vm476_vm2, %v1102_v47  ;;  %1642 = vmatprep.mubr.msk.f32.mxu0 %vm476_vm2, %v1094_v51 }
 0x58d   : > { %1638 = vmatprep.subr.msk.mxu0 %vm476_vm2, %v1100_v10 }
 0x590   : > { %1639 = vmatpush3.xpose.msk.msra.mxu0 %vm476_vm2, %v1100_v10 }
 0x591   : > { %1640 = vmatprep.subr.msk.mxu0 %vm476_vm2, %v1098_v8 }
 0x594   : > { %1641 = vmatpush3.xpose.msk.msra.mxu0 %vm476_vm2, %v1098_v8 }
 0x597   : > { %1643 = vmatmul.mubr.msk.f32.vlgmr.msra.gmra.mxu0 %vm476_vm2, %v1096_v12 }
 0x64b   : > { %v1635_v18 = vpop.f32.mrf.mxu0 }
 0x64d   : > { %v1084_v52 = vpop.f32.mrf.mxu0 }
 0x657   : > { %v1644_v53 = vpop.f32.mrf.mxu0 }
 0x658   : > { %v1191_v54 = vsel %vm567_vm3, %v1644_v53, -inf }
 0x659   : > { %1192 = vmax.xlane.f32.xlu0 %v1191_v54  ;;  %v1179_v55 = vpop.f32.mrf.mxu0 }
 0x65a   : > { %v1188_v56 = vsel %vm567_vm3, %v1179_v55, -inf }
 0x65b   : > { %1189 = vmax.xlane.f32.xlu1 %v1188_v56 }
 0x6e2   : > { %v1193_v57 = vpop.xlane.xlu0 %1192 }
 0x6e3   : > { %v1195_v58 = vsub.f32 %v1644_v53, %v1193_v57 }
 0x6e4   : > { %v1190_v59 = vpop.xlane.xlu1 %1189 }
 0x6e5   : > { %v1198_v60 = vmul.f32 1.442695, %v1195_v58  ;;  %v1194_v61 = vsub.f32 %v1179_v55, %v1190_v59 }
 0x6e7   : > { %1735 = vpow2.f32 %v1198_v60  ;;  %v1196_v62 = vmul.f32 1.442695, %v1194_v61 }
 0x6e9   : > { %1737 = vpow2.f32 %v1196_v62 }
 0x6f4   : > { %v1736_v63 = vpop.eup %1735 }
 0x6f5   : > { %v1203_v0 = vsel %vm567_vm3, %v1736_v63, 0.0 }
 0x6f6   : > { %v1738_v1 = vpop.eup %1737  ;;  %1204 = vadd.xlane.f32.xlu1 %v1203_v0 }
 0x6f7   : > { %v1200_v2 = vsel %vm567_vm3, %v1738_v1, 0.0 }
 0x6f8   : > { %1201 = vadd.xlane.f32.xlu0 %v1200_v2 }
 0x707   : > { %1212 = vrot.lane.b32.xlu1 %v2075_v28, %s1844_s10 }
 0x70b   : > { %1210 = vrot.lane.b32.xlu1 %v2073_v26, %s1844_s10 }
 0x70e   : > { %1214 = vrot.lane.b32.xlu0 %v2079_v34, %s1844_s10 }
 0x70f   : > { %1305 = vrot.lane.b32.xlu1 %v2129_v23, %s1845_s11 }
 0x712   : > { %1303 = vrot.lane.b32.xlu0 %v2131_v24, %s1845_s11 }
 0x713   : > { %1313 = vrot.lane.b32.xlu1 %v1635_v18, %s1846_s13 }
 0x716   : > { %1311 = vrot.lane.b32.xlu0 %v1084_v52, %s1846_s13 }
 0x77f   : > { %v1205_v3 = vpop.xlane.xlu1 %1204 }
 0x780   : > { %1739 = vrcp.f32 %v1205_v3 }
 0x781   : > { %v1202_v4 = vpop.xlane.xlu0 %1201 }
 0x782   : > { %1741 = vrcp.f32 %v1202_v4 }
 0x783   : > { %v1213_v28 = vpop.permute.xlu1 %1212 }
 0x785   : > { %v1215_v5 = vpop.permute.xlu0 %1214 }
 0x786   : > { %1645 = vmatprep.subr.msk.mxu1 %vm596_vm4, %v1215_v5 }
 0x787   : > { %1646 = vmatpush3.msk.msra.mxu1 %vm596_vm4, %v1215_v5  ;;  %v1211_v26 = vpop.permute.xlu1 %1210 }
 0x788   : > { %1647 = vmatprep.subr.mxu1 %v1213_v28 }
 0x789   : > { %1648 = vmatpush3.msra.mxu1 %v1213_v28  ;;  %v1304_v16 = vpop.permute.xlu0 %1303 }
 0x78a   : > { %1649 = vmatprep.subr.mxu1 %v1211_v26  ;;  %v1325_v25 = vsel %vm476_vm2, %v2127_v22, %v1304_v16 }
 0x78b   : > { %1650 = vmatpush3.msra.mxu1 %v1211_v26  ;;  %v1306_v15 = vpop.permute.xlu1 %1305 }
 0x78c   : > { %v1326_v20 = vsel %vm476_vm2, %v2125_v21, %v1306_v15 }
 0x78d   : > { %v1740_v34 = vpop.eup %1739  ;;  %v1312_v19 = vpop.permute.xlu0 %1311 }
 0x78e   : > { %v1209_v11 = vmul.f32 %v1740_v34, %v1736_v63  ;;  %v1327_v29 = vsel %vm295_vm1, %v1325_v25, %v1312_v19 }
 0x78f   : > { %v1742_v6 = vpop.eup %1741  ;;  %v1314_v17 = vpop.permute.xlu1 %1313 }
 0x790   : > { %v1208_v9 = vmul.f32 %v1742_v6, %v1738_v1  ;;  %v1328_v23 = vsel %vm295_vm1, %v1326_v20, %v1314_v17 }
 0x792   : > { %1651 = vmatprep.mubr.msk.f32.mxu1 %vm567_vm3, %v1208_v9 }
 0x793   : > { %1652 = vmatmul.mubr.msk.f32.vlgmr.msra.gmra.mxu1 %vm567_vm3, %v1209_v11 }
 0x853   : > { %v1653_v13 = vpop.f32.mrf.mxu1 }
 0x854   : > { %1321 = vrot.lane.b32.xlu1 %v1653_v13, %s1847_s17 }
 0x855   : > { %v1292_v14 = vpop.f32.mrf.mxu1 }
 0x856   : > { %1319 = vrot.lane.b32.xlu0 %v1292_v14, %s1847_s17 }
 0x8c6   : > { %v1322_v24 = vpop.permute.xlu1 %1321 }
 0x8c7   : > { %v1331_v27 = vsel %vm1329_vm5, %v1328_v23, %v1322_v24 }
 0x8c8   : > { %1334 = vst.msk [vmem:[%s272_s26 + $0x8] sm:$0xff] %vm1332_vm6, %v1331_v27  ;;  %v1320_v30 = vpop.permute.xlu0 %1319 }
 0x8c9   : > { %v1330_v21 = vsel %vm1329_vm5, %v1327_v29, %v1320_v30 }
 0x8ca   : > { %1333 = vst.msk [vmem:[%s272_s26] sm:$0xff] %vm1332_vm6, %v1330_v21 }
 0x8cb   : > { %1784 = shalt.err (!%p1781_p0)
}
 0x8cc   : > { %s1785_s9 = scalar_lea.hbm %s2197_s22, 256  ;;  %s1789_s17 = scalar_lea.hbm %s2246_s5, 512 }
 0x8cd   : > { %p1786_p2 = scmp.ne.s32.totalorder %s2197_s22, %s1785_s9  ;;  %p1790_p3 = scmp.lt.s32.totalorder %s2197_s22, %s2246_s5 }
 0x8ce   : > { %p1791_p6 = scmp.lt.s32.totalorder %s1789_s17, %s1785_s9 }
 0x8cf   : > { %p1787_p9 = pnand %p1786_p2, %p2255_p13 }
 0x8d0   : > { %p1792_p11 = por %p1791_p6, %p1790_p3 }
 0x8d1   : > { %p1788_p1 = pneg %p1787_p9 }
 0x8d3   : > { %p1793_p12 = pnand %p1792_p11, %p1788_p1 }
 0x8d5   : > { %1796 = shalt.err (!%p1793_p12)
}
 0x8d6   : > { %s1849_s25 = smov 128  }
 0x8d7   : > { %1656 = dma.vmem_to_hbm [thread:$0]  (%p2255_p13), %s2191_s12, 256, %s2197_s22, %s1336_s16, %s1849_s25, %s1849_s25, %s1845_s11  }
 0x8d8 PF: > { %s1364_s14 = sand.u32 1, %s1823_s18   ;;  %p2256_p4 = scmp.ne.s32.totalorder %s2252_s6, 0 }
 0x8d9   : > { %p2257_p5 = scmp.ge.s32.totalorder %s1835_s21, 2  ;;  %s1365_s28 = scalar_lea.sflag [#allocation4], %s1364_s14 }
 0x8db   : > { %p1663_p7 = pnand %p2257_p5, %p2256_p4 }
 0x8dd   : > { %p1664_p8 = pneg %p1663_p7 }
 0x8df   : > { %1818 = dma.done.wait (%p1664_p8), %s1365_s28, 256  }
 0x8e0   : > { %1820 = vsyncadd (%p1664_p8), %s1365_s28, 4294967040  ;;  %p18_p10 = scmp.ge.s32.totalorder %s1905_s24, 4   ;;  %s2258_s18 = smov %s1827_s19 }
 0x8e1   : > { %s2259_s19 = smov %s1831_s20  ;;  %s2260_s20 = smov %s1917_s27 }
 0x8e2   : > { %s2261_s21 = smov %s1905_s24  ;;  %20 = sbr.rel (!%p18_p10) target bundleno = 5 (0x5), region = 91 }
 0x8e7   :  { %1370 = vsyncpa [#allocation3], 1 }
 0x8e8   :  { %1372 = vsyncpa [#allocation3 + $0x1], 1 }
 0x8e9   :  { %1373 = vsyncpa [#allocation4], 1 }
 0x8ea   :  { %1375 = vsyncpa [#allocation4 + $0x1], 1 }

</bundles_post_ra>
